<compile_context>
chip_gen: v6e
topology: v6e:2x2x1
jax: 0.10.0
libtpu: 0.0.40
codegen_flags: <defaults>
</compile_context>

<pallas_src>
import math
import functools

import jax
import jax.numpy as jnp
from jax.experimental import pallas as pl
from jax.experimental.pallas import tpu as pltpu

PAD = 0          # Constants.PAD
NEG_INF = -1e9   # same constant the THP reference uses in masked_fill


def _layer_norm(x, gamma, beta, eps=1e-6):
    mean = jnp.mean(x, axis=-1, keepdims=True)
    var = jnp.mean((x - mean) ** 2, axis=-1, keepdims=True)
    return (x - mean) * jax.lax.rsqrt(var + eps) * gamma + beta


def _gelu(x):
    # TODO(synk): F.gelu default is the exact erf GELU; tanh approximation used here
    # (|diff| ~ 1e-3) to stay on EUP-friendly transcendentals.
    c = math.sqrt(2.0 / math.pi)
    return 0.5 * x * (1.0 + jnp.tanh(c * (x + 0.044715 * x * x * x)))


def encoder_stack_kernel(x_ref, tem_ref, npm_ref, kpa_ref, sub_ref,
                         wqkv_ref, wo_ref, w1_ref, b1_ref, w2_ref, vecd_ref,
                         o_ref, *, n_head, d_k, d_v):
    """Full encoder stack. grid = (batch_block, layer); layer is innermost "arbitrary".

    The activation block lives in the output VMEM buffer across the layer axis
    (same output block index for every layer -> resident, flushed to HBM only when
    the batch block changes).  vecd rows: 0=bo, 1=ln1_g, 2=ln1_b, 3=b2, 4=ln2_g, 5=ln2_b.
    """
    bblk, L, D = x_ref.shape
    N = bblk * L
    hdk = n_head * d_k
    hdv = n_head * d_v
    layer = pl.program_id(1)

    # Layer 0: seed the resident activation with the event embeddings.
    @pl.when(layer == 0)
    def _():
        o_ref[...] = x_ref[...]

    # enc_output += tem_enc  (re-added at the start of EVERY layer, as in THP)
    x = o_ref[...] + tem_ref[...]                       # (bblk, L, D) f32
    xf = x.reshape(N, D)
    npm = npm_ref[...].reshape(N, 1)                    # non-pad mask

    # Additive mask: keypad (bblk,1,L) + shared subsequent (L,L), tiled over heads.
    mask_add = kpa_ref[...] + sub_ref[...][None, :, :]  # (bblk, L, L) f32
    if n_head > 1:
        mask_z = jnp.concatenate([mask_add] * n_head, axis=0)   # (H*bblk, L, L)
    else:
        mask_z = mask_add

    # --- multi-head self-attention: fused QKV matmul (bf16 in, f32 acc) -------
    qkv = jnp.dot(xf.astype(jnp.bfloat16), wqkv_ref[0],
                  preferred_element_type=jnp.float32)   # (N, 2*hdk + hdv) f32
    qkv16 = qkv.astype(jnp.bfloat16)

    def split_heads(cols, width):
        # (N, H*width) head-major columns -> (H*bblk, L, width) with z = h*bblk + b.
        parts = [cols[:, h * width:(h + 1) * width][None] for h in range(n_head)]
        return jnp.concatenate(parts, axis=0).reshape(n_head * bblk, L, width)

    qz = split_heads(qkv16[:, :hdk], d_k)               # 1/sqrt(d_k) already folded in
    kz = split_heads(qkv16[:, hdk:2 * hdk], d_k)
    vz = split_heads(qkv16[:, 2 * hdk:], d_v)

    scores = jnp.einsum('zqd,zkd->zqk', qz, kz,
                        preferred_element_type=jnp.float32)      # (H*bblk, L, L)
    scores = scores + mask_z
    scores = scores - jnp.max(scores, axis=-1, keepdims=True)
    p = jnp.exp(scores)
    p = p * pl.reciprocal(jnp.sum(p, axis=-1, keepdims=True), approx=True)

    ctx_z = jnp.einsum('zqk,zkd->zqd', p.astype(jnp.bfloat16), vz,
                       preferred_element_type=jnp.float32)       # (H*bblk, L, d_v)
    ctx = jnp.concatenate(
        [ctx_z[h * bblk:(h + 1) * bblk].reshape(N, d_v) for h in range(n_head)],
        axis=-1)                                                  # (N, hdv), head-major

    vecd = vecd_ref[0]                                            # (6, D) f32
    attn = jnp.dot(ctx.astype(jnp.bfloat16), wo_ref[0],
                   preferred_element_type=jnp.float32)
    attn = attn + vecd[0:1, :]                                    # output-proj bias

    out = attn + xf                                               # residual 1
    out = _layer_norm(out, vecd[1:2, :], vecd[2:3, :])
    out = out * npm                                               # *= non_pad_mask

    # --- position-wise FFN ----------------------------------------------------
    # TODO(synk): for L >~ 512 on v7x (64 MiB VMEM) tile the KV axis flash-style and
    # split the d_inner intermediate instead of materializing (H*bblk,L,L) and (N,d_inner).
    hid = jnp.dot(out.astype(jnp.bfloat16), w1_ref[0],
                  preferred_element_type=jnp.float32) + b1_ref[0]
    hid = _gelu(hid)
    ffn = jnp.dot(hid.astype(jnp.bfloat16), w2_ref[0],
                  preferred_element_type=jnp.float32) + vecd[3:4, :]
    ffn = ffn + out                                               # residual 2
    ffn = _layer_norm(ffn, vecd[4:5, :], vecd[5:6, :])
    ffn = ffn * npm

    o_ref[...] = ffn.reshape(bblk, L, D)                          # stays resident


def _vmem_limits():
    """(vmem_limit_bytes, per-block working-set budget) sized to the chip generation."""
    try:
        cap = int(pltpu.get_tpu_info().vmem_capacity_bytes)       # 128 MiB v5e/v6e, 64 MiB v7x
    except Exception:
        cap = 64 << 20                                            # conservative fallback
    limit = min(int(cap * 0.75), 100 << 20)
    return limit, limit // 2


def _pick_bblk(B, L, D, d_inner, n_head, d_k, d_v, budget):
    """Batch-block size: ~1024 rows to fill the MXU, bounded by a VMEM budget,
    capped at ceil(B/2) so the parallel batch axis has >=2 steps (v7x megacore)."""
    qkv_cols = n_head * (2 * d_k + d_v)

    def block_bytes(bb):
        n = bb * L
        return 4 * (6 * n * D                       # x, tem, resident output (+ pipeline slack)
                    + 3 * n * qkv_cols              # fused qkv + head-stacked q/k/v
                    + 3 * n_head * bb * L * L       # scores, probs, additive mask
                    + 2 * n * d_inner)              # FFN hidden

    bb = max(1, min(B, 1024 // max(L, 1)))
    while bb > 1 and block_bytes(bb) > budget:
        bb -= 1
    if B >= 2:
        bb = min(bb, (B + 1) // 2)
    return max(1, bb)


def encoder_stack(x, tem_enc, npm, keypad_add, subseq_add, params,
                  *, n_head, d_k, d_v, bblk, vmem_limit):
    Bpad, L, D = x.shape
    n_layers = params["wqkv"].shape[0]
    grid = (Bpad // bblk, n_layers)

    def per_batch(shape):
        return pl.BlockSpec((bblk,) + tuple(shape[1:]), lambda b, l: (b, 0, 0))

    def per_layer(shape):
        return pl.BlockSpec((1,) + tuple(shape[1:]), lambda b, l: (l, 0, 0))

    in_specs = [
        per_batch(x.shape),
        per_batch(tem_enc.shape),
        per_batch(npm.shape),
        per_batch(keypad_add.shape),
        pl.BlockSpec(tuple(subseq_add.shape), lambda b, l: (0, 0)),   # shared (L, L)
        per_layer(params["wqkv"].shape),
        per_layer(params["wo"].shape),
        per_layer(params["w1"].shape),
        per_layer(params["b1"].shape),
        per_layer(params["w2"].shape),
        per_layer(params["vec_d"].shape),
    ]
    out_specs = pl.BlockSpec((bblk, L, D), lambda b, l: (b, 0, 0))

    kernel = functools.partial(encoder_stack_kernel, n_head=n_head, d_k=d_k, d_v=d_v)
    return pl.pallas_call(
        kernel,
        out_shape=jax.ShapeDtypeStruct((Bpad, L, D), jnp.float32),
        grid=grid,
        in_specs=in_specs,
        out_specs=out_specs,
        compiler_params=pltpu.CompilerParams(
            dimension_semantics=("parallel", "arbitrary"),
            vmem_limit_bytes=vmem_limit),
    )(x, tem_enc, npm, keypad_add, subseq_add,
      params["wqkv"], params["wo"], params["w1"], params["b1"],
      params["w2"], params["vec_d"])


def encoder_event_forward(event_type, event_time, non_pad_mask, params,
                          *, n_head, d_k, d_v):
    B, L = event_type.shape
    D = params["emb"].shape[1]
    d_inner = params["w1"].shape[-1]

    # temporal_enc (glue, elementwise)
    pv = params["position_vec"]
    result = event_time[:, :, None] / pv
    result = result.at[:, :, 0::2].set(jnp.sin(result[:, :, 0::2]))
    result = result.at[:, :, 1::2].set(jnp.cos(result[:, :, 1::2]))
    tem_enc = (result * non_pad_mask).astype(jnp.float32)

    # Additive masks.  Reference forward overwrites the sparse mask with the key-pad
    # mask before summing, so effective mask == keypad | subsequent.
    keypad_add = jnp.where(event_type == PAD,
                           jnp.float32(NEG_INF), jnp.float32(0.0))[:, None, :]  # (B,1,L)
    q_idx = jax.lax.broadcasted_iota(jnp.int32, (L, L), 0)
    k_idx = jax.lax.broadcasted_iota(jnp.int32, (L, L), 1)
    subseq_add = jnp.where(k_idx > q_idx, jnp.float32(NEG_INF), jnp.float32(0.0))  # (L,L)

    # event embedding gather (glue)
    x = params["emb"][event_type].astype(jnp.float32)          # (B, L, D)
    npm = non_pad_mask.astype(jnp.float32)                     # (B, L, 1)

    vmem_limit, budget = _vmem_limits()
    bblk = _pick_bblk(B, L, D, d_inner, n_head, d_k, d_v, budget)
    n_blocks = pl.cdiv(B, bblk)
    Bpad = n_blocks * bblk
    if Bpad != B:
        pad = ((0, Bpad - B), (0, 0), (0, 0))
        x = jnp.pad(x, pad)
        tem_enc = jnp.pad(tem_enc, pad)
        npm = jnp.pad(npm, pad)
        keypad_add = jnp.pad(keypad_add, pad)

    out = encoder_stack(x, tem_enc, npm, keypad_add, subseq_add, params,
                        n_head=n_head, d_k=d_k, d_v=d_v,
                        bblk=bblk, vmem_limit=vmem_limit)
    return out[:B]


def init_params(key, *, num_types, d_model, d_inner, n_layers, n_head, d_k, d_v):
    position_vec = jnp.array(
        [math.pow(10000.0, 2.0 * (i // 2) / d_model) for i in range(d_model)],
        dtype=jnp.float32)

    k_emb, key = jax.random.split(key)
    emb = 0.1 * jax.random.normal(k_emb, (num_types + 1, d_model), jnp.float32)
    emb = emb.at[PAD].set(0.0)                    # padding_idx = PAD

    inv_temp = 1.0 / math.sqrt(d_k)
    wqkv_l, wo_l, w1_l, b1_l, w2_l, vec_l = [], [], [], [], [], []
    for _ in range(n_layers):
        keys = jax.random.split(key, 8)
        key = keys[-1]
        s = 1.0 / math.sqrt(d_model)
        wq = s * jax.random.normal(keys[0], (n_head, d_model, d_k), jnp.float32)
        wk = s * jax.random.normal(keys[1], (n_head, d_model, d_k), jnp.float32)
        wv = s * jax.random.normal(keys[2], (n_head, d_model, d_v), jnp.float32)
        wo = (1.0 / math.sqrt(n_head * d_v)) * jax.random.normal(
            keys[3], (n_head, d_v, d_model), jnp.float32)
        bo = jnp.zeros((1, d_model), jnp.float32)
        ln1_g = jnp.ones((1, d_model), jnp.float32)
        ln1_b = jnp.zeros((1, d_model), jnp.float32)
        w1 = s * jax.random.normal(keys[4], (d_model, d_inner), jnp.float32)
        b1 = 0.01 * jax.random.normal(keys[5], (1, d_inner), jnp.float32)
        w2 = (1.0 / math.sqrt(d_inner)) * jax.random.normal(
            keys[6], (d_inner, d_model), jnp.float32)
        b2 = jnp.zeros((1, d_model), jnp.float32)
        ln2_g = jnp.ones((1, d_model), jnp.float32)
        ln2_b = jnp.zeros((1, d_model), jnp.float32)

        # Fused QKV, columns head-major: [Q (pre-scaled by 1/sqrt(d_k)) | K | V].
        wqkv = jnp.concatenate([
            jnp.transpose(wq * inv_temp, (1, 0, 2)).reshape(d_model, n_head * d_k),
            jnp.transpose(wk, (1, 0, 2)).reshape(d_model, n_head * d_k),
            jnp.transpose(wv, (1, 0, 2)).reshape(d_model, n_head * d_v)], axis=1)
        wqkv_l.append(wqkv)
        wo_l.append(wo.reshape(n_head * d_v, d_model))
        w1_l.append(w1)
        b1_l.append(b1)
        w2_l.append(w2)
        vec_l.append(jnp.concatenate([bo, ln1_g, ln1_b, b2, ln2_g, ln2_b], axis=0))

    return dict(
        position_vec=position_vec,
        emb=emb,
        # weight slabs carry a leading layer axis and are stored in bf16 for the MXU
        wqkv=jnp.stack(wqkv_l).astype(jnp.bfloat16),   # (n_layers, D, 2*H*dk + H*dv)
        wo=jnp.stack(wo_l).astype(jnp.bfloat16),       # (n_layers, H*dv, D)
        w1=jnp.stack(w1_l).astype(jnp.bfloat16),       # (n_layers, D, d_inner)
        b1=jnp.stack(b1_l),                            # (n_layers, 1, d_inner) f32
        w2=jnp.stack(w2_l).astype(jnp.bfloat16),       # (n_layers, d_inner, D)
        vec_d=jnp.stack(vec_l),                        # (n_layers, 6, D) f32
    )


if __name__ == "__main__":
    # small, module-consistent shapes
    num_types, d_model, d_inner = 5, 32, 64
    n_layers, n_head, d_k, d_v = 2, 2, 16, 16
    B, L = 2, 8

    key = jax.random.PRNGKey(0)
    kp, kt, ktime = jax.random.split(key, 3)
    params = init_params(kp, num_types=num_types, d_model=d_model, d_inner=d_inner,
                         n_layers=n_layers, n_head=n_head, d_k=d_k, d_v=d_v)

    event_type = jax.random.randint(kt, (B, L), 1, num_types + 1, dtype=jnp.int32)
    event_type = event_type.at[1, 5:].set(PAD)   # exercise the key-pad mask
    dt = jax.random.uniform(ktime, (B, L), jnp.float32, 0.1, 1.0)
    event_time = jnp.cumsum(dt, axis=1) * (event_type != PAD).astype(jnp.float32)
    non_pad_mask = (event_type != PAD).astype(jnp.float32)[:, :, None]

    out = encoder_event_forward(event_type, event_time, non_pad_mask, params,
                                n_head=n_head, d_k=d_k, d_v=d_v)
    out = jax.block_until_ready(out)
    assert out.shape == (B, L, d_model)
    assert bool(jnp.all(jnp.isfinite(out)))
    print("KERNEL_OK")
</pallas_src>

<mosaic_0001>
module attributes {stable_mosaic.version = 11 : i64} {
  func.func @encoder_stack_kernel(%arg0: i32, %arg1: i32, %arg2: memref<1x8x32xf32, #tpu.memory_space<vmem>>, %arg3: memref<1x8x32xf32, #tpu.memory_space<vmem>>, %arg4: memref<1x8x1xf32, #tpu.memory_space<vmem>>, %arg5: memref<1x1x8xf32, #tpu.memory_space<vmem>>, %arg6: memref<8x8xf32, #tpu.memory_space<vmem>>, %arg7: memref<1x32x96xbf16, #tpu.memory_space<vmem>>, %arg8: memref<1x32x32xbf16, #tpu.memory_space<vmem>>, %arg9: memref<1x32x64xbf16, #tpu.memory_space<vmem>>, %arg10: memref<1x1x64xf32, #tpu.memory_space<vmem>>, %arg11: memref<1x64x32xbf16, #tpu.memory_space<vmem>>, %arg12: memref<1x6x32xf32, #tpu.memory_space<vmem>>, %arg13: memref<1x8x32xf32, #tpu.memory_space<vmem>>) attributes {dimension_semantics = [#tpu.dimension_semantics<parallel>, #tpu.dimension_semantics<arbitrary>], iteration_bounds = array<i64: 2, 2>, scalar_prefetch = 0 : i64, scratch_operands = 0 : i64, tpu.core_type = #tpu.core_type<tc>, window_params = [{transform_indices = @transform_0, window_bounds = array<i64: 1, 8, 32>}, {transform_indices = @transform_1, window_bounds = array<i64: 1, 8, 32>}, {transform_indices = @transform_2, window_bounds = array<i64: 1, 8, 1>}, {transform_indices = @transform_3, window_bounds = array<i64: 1, 1, 8>}, {pipeline_mode = #tpu.pipeline_mode<synchronous>, transform_indices = @transform_4, window_bounds = array<i64: 8, 8>}, {transform_indices = @transform_5, window_bounds = array<i64: 1, 32, 96>}, {transform_indices = @transform_6, window_bounds = array<i64: 1, 32, 32>}, {transform_indices = @transform_7, window_bounds = array<i64: 1, 32, 64>}, {transform_indices = @transform_8, window_bounds = array<i64: 1, 1, 64>}, {transform_indices = @transform_9, window_bounds = array<i64: 1, 64, 32>}, {transform_indices = @transform_10, window_bounds = array<i64: 1, 6, 32>}, {transform_indices = @transform_11, window_bounds = array<i64: 1, 8, 32>}]} {
    %c0_i32 = arith.constant 0 : i32
    %0 = arith.cmpi eq, %arg1, %c0_i32 : i32
    %1 = arith.extui %0 : i1 to i32
    %c0_i32_0 = arith.constant 0 : i32
    %2 = arith.cmpi ne, %1, %c0_i32_0 : i32
    scf.if %2 {
      %c0_56 = arith.constant 0 : index
      %c0_57 = arith.constant 0 : index
      %c0_58 = arith.constant 0 : index
      %150 = vector.load %arg2[%c0_56, %c0_57, %c0_58] : memref<1x8x32xf32, #tpu.memory_space<vmem>>, vector<1x8x32xf32>
      %c0_59 = arith.constant 0 : index
      %c0_60 = arith.constant 0 : index
      %c0_61 = arith.constant 0 : index
      %151 = vector.load %arg13[%c0_59, %c0_60, %c0_61] : memref<1x8x32xf32, #tpu.memory_space<vmem>>, vector<1x8x32xf32>
      tpu.vector_store %arg13[%c0_59, %c0_60, %c0_61], %150 {strides = array<i32>} : memref<1x8x32xf32, #tpu.memory_space<vmem>>, vector<1x8x32xf32>,
    } else {
    }
    %c0 = arith.constant 0 : index
    %c0_1 = arith.constant 0 : index
    %c0_2 = arith.constant 0 : index
    %3 = vector.load %arg13[%c0, %c0_1, %c0_2] : memref<1x8x32xf32, #tpu.memory_space<vmem>>, vector<1x8x32xf32>
    %c0_3 = arith.constant 0 : index
    %c0_4 = arith.constant 0 : index
    %c0_5 = arith.constant 0 : index
    %4 = vector.load %arg3[%c0_3, %c0_4, %c0_5] : memref<1x8x32xf32, #tpu.memory_space<vmem>>, vector<1x8x32xf32>
    %5 = arith.addf %3, %4 : vector<1x8x32xf32>
    %6 = vector.shape_cast %5 : vector<1x8x32xf32> to vector<8x32xf32>
    %c0_6 = arith.constant 0 : index
    %c0_7 = arith.constant 0 : index
    %c0_8 = arith.constant 0 : index
    %7 = vector.load %arg4[%c0_6, %c0_7, %c0_8] : memref<1x8x1xf32, #tpu.memory_space<vmem>>, vector<1x8x1xf32>
    %8 = vector.shape_cast %7 : vector<1x8x1xf32> to vector<8x1xf32>
    %c0_9 = arith.constant 0 : index
    %c0_10 = arith.constant 0 : index
    %c0_11 = arith.constant 0 : index
    %9 = vector.load %arg5[%c0_9, %c0_10, %c0_11] : memref<1x1x8xf32, #tpu.memory_space<vmem>>, vector<1x1x8xf32>
    %c0_12 = arith.constant 0 : index
    %c0_13 = arith.constant 0 : index
    %10 = vector.load %arg6[%c0_12, %c0_13] : memref<8x8xf32, #tpu.memory_space<vmem>>, vector<8x8xf32>
    %11 = vector.shape_cast %10 : vector<8x8xf32> to vector<1x8x8xf32>
    %12 = vector.broadcast %9 : vector<1x1x8xf32> to vector<1x8x8xf32>
    %13 = arith.addf %12, %11 : vector<1x8x8xf32>
    %14 = tpu.concatenate %13, %13 in 0 : vector<1x8x8xf32>, vector<1x8x8xf32> -> vector<2x8x8xf32>
    %15 = arith.truncf %6 : vector<8x32xf32> to vector<8x32xbf16>
    %c0_14 = arith.constant 0 : index
    %c0_15 = arith.constant 0 : index
    %c0_16 = arith.constant 0 : index
    %16 = vector.load %arg7[%c0_14, %c0_15, %c0_16] : memref<1x32x96xbf16, #tpu.memory_space<vmem>>, vector<1x32x96xbf16>
    %17 = vector.shape_cast %16 : vector<1x32x96xbf16> to vector<32x96xbf16>
    %cst = arith.constant dense<0.000000e+00> : vector<8x96xf32>
    %18 = tpu.matmul %15, %17, %cst {dimension_numbers = #tpu.dot_dimension_numbers<[1], [0], [0], [1], [0, 0, 1, 1], [], []>} : vector<8x32xbf16>, vector<32x96xbf16>, vector<8x96xf32> -> vector<8x96xf32>
    %19 = arith.truncf %18 : vector<8x96xf32> to vector<8x96xbf16>
    %20 = vector.extract_strided_slice %19 {offsets = [0, 0], sizes = [8, 32], strides = [1, 1]} : vector<8x96xbf16> to vector<8x32xbf16>
    %21 = vector.extract_strided_slice %20 {offsets = [0, 0], sizes = [8, 16], strides = [1, 1]} : vector<8x32xbf16> to vector<8x16xbf16>
    %22 = vector.shape_cast %21 : vector<8x16xbf16> to vector<1x8x16xbf16>
    %23 = vector.extract_strided_slice %20 {offsets = [0, 16], sizes = [8, 16], strides = [1, 1]} : vector<8x32xbf16> to vector<8x16xbf16>
    %24 = vector.shape_cast %23 : vector<8x16xbf16> to vector<1x8x16xbf16>
    %25 = tpu.concatenate %22, %24 in 0 : vector<1x8x16xbf16>, vector<1x8x16xbf16> -> vector<2x8x16xbf16>
    %26 = vector.extract_strided_slice %19 {offsets = [0, 32], sizes = [8, 32], strides = [1, 1]} : vector<8x96xbf16> to vector<8x32xbf16>
    %27 = vector.extract_strided_slice %26 {offsets = [0, 0], sizes = [8, 16], strides = [1, 1]} : vector<8x32xbf16> to vector<8x16xbf16>
    %28 = vector.shape_cast %27 : vector<8x16xbf16> to vector<1x8x16xbf16>
    %29 = vector.extract_strided_slice %26 {offsets = [0, 16], sizes = [8, 16], strides = [1, 1]} : vector<8x32xbf16> to vector<8x16xbf16>
    %30 = vector.shape_cast %29 : vector<8x16xbf16> to vector<1x8x16xbf16>
    %31 = tpu.concatenate %28, %30 in 0 : vector<1x8x16xbf16>, vector<1x8x16xbf16> -> vector<2x8x16xbf16>
    %32 = vector.extract_strided_slice %19 {offsets = [0, 64], sizes = [8, 32], strides = [1, 1]} : vector<8x96xbf16> to vector<8x32xbf16>
    %33 = vector.extract_strided_slice %32 {offsets = [0, 0], sizes = [8, 16], strides = [1, 1]} : vector<8x32xbf16> to vector<8x16xbf16>
    %34 = vector.shape_cast %33 : vector<8x16xbf16> to vector<1x8x16xbf16>
    %35 = vector.extract_strided_slice %32 {offsets = [0, 16], sizes = [8, 16], strides = [1, 1]} : vector<8x32xbf16> to vector<8x16xbf16>
    %36 = vector.shape_cast %35 : vector<8x16xbf16> to vector<1x8x16xbf16>
    %37 = tpu.concatenate %34, %36 in 0 : vector<1x8x16xbf16>, vector<1x8x16xbf16> -> vector<2x8x16xbf16>
    "tpu.trace_start"() <{level = 10 : i32, message = "zqd,zkd->zqk"}> : () -> ()
    %cst_17 = arith.constant dense<0.000000e+00> : vector<2x8x8xf32>
    %38 = tpu.matmul %25, %31, %cst_17 {dimension_numbers = #tpu.dot_dimension_numbers<[2], [2], [1], [1], [0, 0, 0, 1, 1, 1], [0], [0]>} : vector<2x8x16xbf16>, vector<2x8x16xbf16>, vector<2x8x8xf32> -> vector<2x8x8xf32>
    "tpu.trace_stop"() : () -> ()
    %39 = arith.addf %38, %14 : vector<2x8x8xf32>
    %cst_18 = arith.constant dense<0xFF800000> : vector<2x8xf32>
    %40 = vector.multi_reduction <maximumf>, %39, %cst_18 [2] : vector<2x8x8xf32> to vector<2x8xf32>
    %41 = vector.shape_cast %40 : vector<2x8xf32> to vector<2x8x1xf32>
    %42 = vector.broadcast %41 : vector<2x8x1xf32> to vector<2x8x8xf32>
    %43 = arith.subf %39, %42 : vector<2x8x8xf32>
    %44 = math.exp %43 : vector<2x8x8xf32>
    %cst_19 = arith.constant dense<0.000000e+00> : vector<2x8xf32>
    %45 = vector.multi_reduction <add>, %44, %cst_19 [2] : vector<2x8x8xf32> to vector<2x8xf32>
    %46 = vector.shape_cast %45 : vector<2x8xf32> to vector<2x8x1xf32>
    %47 = tpu.reciprocal %46 {approx = true} : vector<2x8x1xf32> -> vector<2x8x1xf32>
    %48 = vector.broadcast %47 : vector<2x8x1xf32> to vector<2x8x8xf32>
    %49 = arith.mulf %44, %48 : vector<2x8x8xf32>
    %50 = arith.truncf %49 : vector<2x8x8xf32> to vector<2x8x8xbf16>
    "tpu.trace_start"() <{level = 10 : i32, message = "zqk,zkd->zqd"}> : () -> ()
    %cst_20 = arith.constant dense<0.000000e+00> : vector<2x8x16xf32>
    %51 = tpu.matmul %50, %37, %cst_20 {dimension_numbers = #tpu.dot_dimension_numbers<[2], [1], [1], [2], [0, 0, 0, 1, 1, 2], [0], [0]>} : vector<2x8x8xbf16>, vector<2x8x16xbf16>, vector<2x8x16xf32> -> vector<2x8x16xf32>
    "tpu.trace_stop"() : () -> ()
    %52 = vector.extract_strided_slice %51 {offsets = [0, 0, 0], sizes = [1, 8, 16], strides = [1, 1, 1]} : vector<2x8x16xf32> to vector<1x8x16xf32>
    %53 = vector.shape_cast %52 : vector<1x8x16xf32> to vector<8x16xf32>
    %54 = vector.extract_strided_slice %51 {offsets = [1, 0, 0], sizes = [1, 8, 16], strides = [1, 1, 1]} : vector<2x8x16xf32> to vector<1x8x16xf32>
    %55 = vector.shape_cast %54 : vector<1x8x16xf32> to vector<8x16xf32>
    %56 = tpu.concatenate %53, %55 in 1 : vector<8x16xf32>, vector<8x16xf32> -> vector<8x32xf32>
    %c0_21 = arith.constant 0 : index
    %c0_22 = arith.constant 0 : index
    %c0_23 = arith.constant 0 : index
    %57 = vector.load %arg12[%c0_21, %c0_22, %c0_23] : memref<1x6x32xf32, #tpu.memory_space<vmem>>, vector<1x6x32xf32>
    %58 = vector.shape_cast %57 : vector<1x6x32xf32> to vector<6x32xf32>
    %59 = arith.truncf %56 : vector<8x32xf32> to vector<8x32xbf16>
    %c0_24 = arith.constant 0 : index
    %c0_25 = arith.constant 0 : index
    %c0_26 = arith.constant 0 : index
    %60 = vector.load %arg8[%c0_24, %c0_25, %c0_26] : memref<1x32x32xbf16, #tpu.memory_space<vmem>>, vector<1x32x32xbf16>
    %61 = vector.shape_cast %60 : vector<1x32x32xbf16> to vector<32x32xbf16>
    %cst_27 = arith.constant dense<0.000000e+00> : vector<8x32xf32>
    %62 = tpu.matmul %59, %61, %cst_27 {dimension_numbers = #tpu.dot_dimension_numbers<[1], [0], [0], [1], [0, 0, 1, 1], [], []>} : vector<8x32xbf16>, vector<32x32xbf16>, vector<8x32xf32> -> vector<8x32xf32>
    %63 = vector.extract_strided_slice %58 {offsets = [0, 0], sizes = [1, 32], strides = [1, 1]} : vector<6x32xf32> to vector<1x32xf32>
    %64 = vector.broadcast %63 : vector<1x32xf32> to vector<8x32xf32>
    %65 = arith.addf %62, %64 : vector<8x32xf32>
    %66 = arith.addf %65, %6 : vector<8x32xf32>
    %67 = vector.extract_strided_slice %58 {offsets = [1, 0], sizes = [1, 32], strides = [1, 1]} : vector<6x32xf32> to vector<1x32xf32>
    %68 = vector.extract_strided_slice %58 {offsets = [2, 0], sizes = [1, 32], strides = [1, 1]} : vector<6x32xf32> to vector<1x32xf32>
    %cst_28 = arith.constant dense<0.000000e+00> : vector<8xf32>
    %69 = vector.multi_reduction <add>, %66, %cst_28 [1] : vector<8x32xf32> to vector<8xf32>
    %70 = vector.shape_cast %69 : vector<8xf32> to vector<8x1xf32>
    %cst_29 = arith.constant 3.200000e+01 : f32
    %71 = vector.broadcast %cst_29 : f32 to vector<8x1xf32>
    %72 = arith.divf %70, %71 : vector<8x1xf32>
    %73 = vector.broadcast %72 : vector<8x1xf32> to vector<8x32xf32>
    %74 = arith.subf %66, %73 : vector<8x32xf32>
    %75 = arith.mulf %74, %74 : vector<8x32xf32>
    %cst_30 = arith.constant dense<0.000000e+00> : vector<8xf32>
    %76 = vector.multi_reduction <add>, %75, %cst_30 [1] : vector<8x32xf32> to vector<8xf32>
    %77 = vector.shape_cast %76 : vector<8xf32> to vector<8x1xf32>
    %cst_31 = arith.constant 3.200000e+01 : f32
    %78 = vector.broadcast %cst_31 : f32 to vector<8x1xf32>
    %79 = arith.divf %77, %78 : vector<8x1xf32>
    %80 = vector.broadcast %72 : vector<8x1xf32> to vector<8x32xf32>
    %81 = arith.subf %66, %80 : vector<8x32xf32>
    %cst_32 = arith.constant 9.99999997E-7 : f32
    %82 = vector.broadcast %cst_32 : f32 to vector<8x1xf32>
    %83 = arith.addf %79, %82 : vector<8x1xf32>
    %84 = math.rsqrt %83 : vector<8x1xf32>
    %85 = vector.broadcast %84 : vector<8x1xf32> to vector<8x32xf32>
    %86 = arith.mulf %81, %85 : vector<8x32xf32>
    %87 = vector.broadcast %67 : vector<1x32xf32> to vector<8x32xf32>
    %88 = arith.mulf %86, %87 : vector<8x32xf32>
    %89 = vector.broadcast %68 : vector<1x32xf32> to vector<8x32xf32>
    %90 = arith.addf %88, %89 : vector<8x32xf32>
    %91 = vector.broadcast %8 : vector<8x1xf32> to vector<8x32xf32>
    %92 = arith.mulf %90, %91 : vector<8x32xf32>
    %93 = arith.truncf %92 : vector<8x32xf32> to vector<8x32xbf16>
    %c0_33 = arith.constant 0 : index
    %c0_34 = arith.constant 0 : index
    %c0_35 = arith.constant 0 : index
    %94 = vector.load %arg9[%c0_33, %c0_34, %c0_35] : memref<1x32x64xbf16, #tpu.memory_space<vmem>>, vector<1x32x64xbf16>
    %95 = vector.shape_cast %94 : vector<1x32x64xbf16> to vector<32x64xbf16>
    %cst_36 = arith.constant dense<0.000000e+00> : vector<8x64xf32>
    %96 = tpu.matmul %93, %95, %cst_36 {dimension_numbers = #tpu.dot_dimension_numbers<[1], [0], [0], [1], [0, 0, 1, 1], [], []>} : vector<8x32xbf16>, vector<32x64xbf16>, vector<8x64xf32> -> vector<8x64xf32>
    %c0_37 = arith.constant 0 : index
    %c0_38 = arith.constant 0 : index
    %c0_39 = arith.constant 0 : index
    %97 = vector.load %arg10[%c0_37, %c0_38, %c0_39] : memref<1x1x64xf32, #tpu.memory_space<vmem>>, vector<1x1x64xf32>
    %98 = vector.shape_cast %97 : vector<1x1x64xf32> to vector<1x64xf32>
    %99 = vector.broadcast %98 : vector<1x64xf32> to vector<8x64xf32>
    %100 = arith.addf %96, %99 : vector<8x64xf32>
    %cst_40 = arith.constant 5.000000e-01 : f32
    %101 = vector.broadcast %cst_40 : f32 to vector<8x64xf32>
    %102 = arith.mulf %101, %100 : vector<8x64xf32>
    %cst_41 = arith.constant 4.471500e-02 : f32
    %103 = vector.broadcast %cst_41 : f32 to vector<8x64xf32>
    %104 = arith.mulf %103, %100 : vector<8x64xf32>
    %105 = arith.mulf %104, %100 : vector<8x64xf32>
    %106 = arith.mulf %105, %100 : vector<8x64xf32>
    %107 = arith.addf %100, %106 : vector<8x64xf32>
    %cst_42 = arith.constant 0.797884583 : f32
    %108 = vector.broadcast %cst_42 : f32 to vector<8x64xf32>
    %109 = arith.mulf %108, %107 : vector<8x64xf32>
    %110 = math.tanh %109 : vector<8x64xf32>
    %cst_43 = arith.constant 1.000000e+00 : f32
    %111 = vector.broadcast %cst_43 : f32 to vector<8x64xf32>
    %112 = arith.addf %111, %110 : vector<8x64xf32>
    %113 = arith.mulf %102, %112 : vector<8x64xf32>
    %114 = arith.truncf %113 : vector<8x64xf32> to vector<8x64xbf16>
    %c0_44 = arith.constant 0 : index
    %c0_45 = arith.constant 0 : index
    %c0_46 = arith.constant 0 : index
    %115 = vector.load %arg11[%c0_44, %c0_45, %c0_46] : memref<1x64x32xbf16, #tpu.memory_space<vmem>>, vector<1x64x32xbf16>
    %116 = vector.shape_cast %115 : vector<1x64x32xbf16> to vector<64x32xbf16>
    %cst_47 = arith.constant dense<0.000000e+00> : vector<8x32xf32>
    %117 = tpu.matmul %114, %116, %cst_47 {dimension_numbers = #tpu.dot_dimension_numbers<[1], [0], [0], [1], [0, 0, 1, 1], [], []>} : vector<8x64xbf16>, vector<64x32xbf16>, vector<8x32xf32> -> vector<8x32xf32>
    %118 = vector.extract_strided_slice %58 {offsets = [3, 0], sizes = [1, 32], strides = [1, 1]} : vector<6x32xf32> to vector<1x32xf32>
    %119 = vector.broadcast %118 : vector<1x32xf32> to vector<8x32xf32>
    %120 = arith.addf %117, %119 : vector<8x32xf32>
    %121 = arith.addf %120, %92 : vector<8x32xf32>
    %122 = vector.extract_strided_slice %58 {offsets = [4, 0], sizes = [1, 32], strides = [1, 1]} : vector<6x32xf32> to vector<1x32xf32>
    %123 = vector.extract_strided_slice %58 {offsets = [5, 0], sizes = [1, 32], strides = [1, 1]} : vector<6x32xf32> to vector<1x32xf32>
    %cst_48 = arith.constant dense<0.000000e+00> : vector<8xf32>
    %124 = vector.multi_reduction <add>, %121, %cst_48 [1] : vector<8x32xf32> to vector<8xf32>
    %125 = vector.shape_cast %124 : vector<8xf32> to vector<8x1xf32>
    %cst_49 = arith.constant 3.200000e+01 : f32
    %126 = vector.broadcast %cst_49 : f32 to vector<8x1xf32>
    %127 = arith.divf %125, %126 : vector<8x1xf32>
    %128 = vector.broadcast %127 : vector<8x1xf32> to vector<8x32xf32>
    %129 = arith.subf %121, %128 : vector<8x32xf32>
    %130 = arith.mulf %129, %129 : vector<8x32xf32>
    %cst_50 = arith.constant dense<0.000000e+00> : vector<8xf32>
    %131 = vector.multi_reduction <add>, %130, %cst_50 [1] : vector<8x32xf32> to vector<8xf32>
    %132 = vector.shape_cast %131 : vector<8xf32> to vector<8x1xf32>
    %cst_51 = arith.constant 3.200000e+01 : f32
    %133 = vector.broadcast %cst_51 : f32 to vector<8x1xf32>
    %134 = arith.divf %132, %133 : vector<8x1xf32>
    %135 = vector.broadcast %127 : vector<8x1xf32> to vector<8x32xf32>
    %136 = arith.subf %121, %135 : vector<8x32xf32>
    %cst_52 = arith.constant 9.99999997E-7 : f32
    %137 = vector.broadcast %cst_52 : f32 to vector<8x1xf32>
    %138 = arith.addf %134, %137 : vector<8x1xf32>
    %139 = math.rsqrt %138 : vector<8x1xf32>
    %140 = vector.broadcast %139 : vector<8x1xf32> to vector<8x32xf32>
    %141 = arith.mulf %136, %140 : vector<8x32xf32>
    %142 = vector.broadcast %122 : vector<1x32xf32> to vector<8x32xf32>
    %143 = arith.mulf %141, %142 : vector<8x32xf32>
    %144 = vector.broadcast %123 : vector<1x32xf32> to vector<8x32xf32>
    %145 = arith.addf %143, %144 : vector<8x32xf32>
    %146 = vector.broadcast %8 : vector<8x1xf32> to vector<8x32xf32>
    %147 = arith.mulf %145, %146 : vector<8x32xf32>
    %148 = vector.shape_cast %147 : vector<8x32xf32> to vector<1x8x32xf32>
    %c0_53 = arith.constant 0 : index
    %c0_54 = arith.constant 0 : index
    %c0_55 = arith.constant 0 : index
    %149 = vector.load %arg13[%c0_53, %c0_54, %c0_55] : memref<1x8x32xf32, #tpu.memory_space<vmem>>, vector<1x8x32xf32>
    tpu.vector_store %arg13[%c0_53, %c0_54, %c0_55], %148 {strides = array<i32>} : memref<1x8x32xf32, #tpu.memory_space<vmem>>, vector<1x8x32xf32>,
    return
  }
  func.func @transform_0(%arg0: i32, %arg1: i32) -> (i32, i32, i32) {
    %c0_i32 = arith.constant 0 : i32
    %c0_i32_0 = arith.constant 0 : i32
    %c0_i32_1 = arith.constant 0 : i32
    return %arg0, %c0_i32, %c0_i32_0 : i32, i32, i32
  }
  func.func @transform_1(%arg0: i32, %arg1: i32) -> (i32, i32, i32) {
    %c0_i32 = arith.constant 0 : i32
    %c0_i32_0 = arith.constant 0 : i32
    %c0_i32_1 = arith.constant 0 : i32
    return %arg0, %c0_i32, %c0_i32_0 : i32, i32, i32
  }
  func.func @transform_2(%arg0: i32, %arg1: i32) -> (i32, i32, i32) {
    %c0_i32 = arith.constant 0 : i32
    %c0_i32_0 = arith.constant 0 : i32
    %c0_i32_1 = arith.constant 0 : i32
    return %arg0, %c0_i32, %c0_i32_0 : i32, i32, i32
  }
  func.func @transform_3(%arg0: i32, %arg1: i32) -> (i32, i32, i32) {
    %c0_i32 = arith.constant 0 : i32
    %c0_i32_0 = arith.constant 0 : i32
    %c0_i32_1 = arith.constant 0 : i32
    return %arg0, %c0_i32, %c0_i32_0 : i32, i32, i32
  }
  func.func @transform_4(%arg0: i32, %arg1: i32) -> (i32, i32) {
    %c0_i32 = arith.constant 0 : i32
    %c0_i32_0 = arith.constant 0 : i32
    %c0_i32_1 = arith.constant 0 : i32
    return %c0_i32, %c0_i32_0 : i32, i32
  }
  func.func @transform_5(%arg0: i32, %arg1: i32) -> (i32, i32, i32) {
    %c0_i32 = arith.constant 0 : i32
    %c0_i32_0 = arith.constant 0 : i32
    %c0_i32_1 = arith.constant 0 : i32
    return %arg1, %c0_i32, %c0_i32_0 : i32, i32, i32
  }
  func.func @transform_6(%arg0: i32, %arg1: i32) -> (i32, i32, i32) {
    %c0_i32 = arith.constant 0 : i32
    %c0_i32_0 = arith.constant 0 : i32
    %c0_i32_1 = arith.constant 0 : i32
    return %arg1, %c0_i32, %c0_i32_0 : i32, i32, i32
  }
  func.func @transform_7(%arg0: i32, %arg1: i32) -> (i32, i32, i32) {
    %c0_i32 = arith.constant 0 : i32
    %c0_i32_0 = arith.constant 0 : i32
    %c0_i32_1 = arith.constant 0 : i32
    return %arg1, %c0_i32, %c0_i32_0 : i32, i32, i32
  }
  func.func @transform_8(%arg0: i32, %arg1: i32) -> (i32, i32, i32) {
    %c0_i32 = arith.constant 0 : i32
    %c0_i32_0 = arith.constant 0 : i32
    %c0_i32_1 = arith.constant 0 : i32
    return %arg1, %c0_i32, %c0_i32_0 : i32, i32, i32
  }
  func.func @transform_9(%arg0: i32, %arg1: i32) -> (i32, i32, i32) {
    %c0_i32 = arith.constant 0 : i32
    %c0_i32_0 = arith.constant 0 : i32
    %c0_i32_1 = arith.constant 0 : i32
    return %arg1, %c0_i32, %c0_i32_0 : i32, i32, i32
  }
  func.func @transform_10(%arg0: i32, %arg1: i32) -> (i32, i32, i32) {
    %c0_i32 = arith.constant 0 : i32
    %c0_i32_0 = arith.constant 0 : i32
    %c0_i32_1 = arith.constant 0 : i32
    return %arg1, %c0_i32, %c0_i32_0 : i32, i32, i32
  }
  func.func @transform_11(%arg0: i32, %arg1: i32) -> (i32, i32, i32) {
    %c0_i32 = arith.constant 0 : i32
    %c0_i32_0 = arith.constant 0 : i32
    %c0_i32_1 = arith.constant 0 : i32
    return %arg0, %c0_i32, %c0_i32_0 : i32, i32, i32
  }
}

</mosaic_0001>

<bundles_post_ra>
// kernel: tpu_custom_call.1
= control target key start
LH: loop header
LB: loop body
LE: loop exit
PB: predicated region body
PF: predicated region fallthrough
CT: control target
= control target key end

     0   :  { %s2193_s0 = inlined_call_operand.vmem [shape: f32[2,8,32], index: 0, kind: input, shape index: {}]   ;;  %s2194_s1 = inlined_call_operand.hbm [shape: f32[2,8,32], index: 1, kind: input, shape index: {}]   ;;  %s2195_s2 = inlined_call_operand.vmem [shape: f32[2,8,1], index: 2, kind: input, shape index: {}]   ;;  %s2196_s3 = inlined_call_operand.vmem [shape: f32[2,1,8], index: 3, kind: input, shape index: {}]   ;;  %s2197_s4 = inlined_call_operand.hbm [shape: f32[8,8], index: 4, kind: input, shape index: {}]   ;;  %s2198_s5 = inlined_call_operand.vmem [shape: bf16[2,32,96], index: 5, kind: input, shape index: {}]   ;;  %s2199_s6 = inlined_call_operand.vmem [shape: bf16[2,32,32], index: 6, kind: input, shape index: {}]   ;;  %s2200_s7 = inlined_call_operand.vmem [shape: bf16[2,32,64], index: 7, kind: input, shape index: {}]   ;;  %s2201_s8 = inlined_call_operand.vmem [shape: f32[2,1,64], index: 8, kind: input, shape index: {}]   ;;  %s2202_s9 = inlined_call_operand.vmem [shape: bf16[2,64,32], index: 9, kind: input, shape index: {}]   ;;  %s2203_s10 = inlined_call_operand.vmem [shape: f32[2,6,32], index: 10, kind: input, shape index: {}]   ;;  %s2204_s11 = inlined_call_operand.hbm [shape: f32[2,8,32], index: 11, kind: output, shape index: {}]  }
   0x1   :  { %2218 = sst [smem:[#allocation22_spill]] %s2193_s0 }
   0x2   :  { %2219 = sst [smem:[#allocation23_spill]] %s2194_s1 }
   0x3   :  { %2220 = sst [smem:[#allocation24_spill]] %s2195_s2 }
   0x4   :  { %2221 = sst [smem:[#allocation25_spill]] %s2197_s4 }
   0x5   :  { %2222 = sst [smem:[#allocation26_spill]] %s2198_s5 }
   0x6   :  { %2223 = sst [smem:[#allocation27_spill]] %s2202_s9 }
   0x7   :  { %2224 = sst [smem:[#allocation28_spill]] %s2203_s10 }
   0x8   :  { %2225 = sst [smem:[#allocation29_spill]] %s2204_s11 }
   0x9   :  { %16 = vsyncpa [#allocation3], 0 }
   0xa   :  { %18 = vsyncpa [#allocation3 + $0x1], 0 }
   0xb   :  { %19 = vsyncpa [#allocation6], 0 }
   0xc   :  { %20 = vsyncpa [#allocation4], 0 }
   0xd   :  { %22 = vsyncpa [#allocation4 + $0x1], 0  ;;  %s1863_s17 = smov 0   ;;  %s1865_s18 = smov 0  }
   0xe   :  { %s1867_s19 = smov 0   ;;  %s1869_s20 = smov 0  }
   0xf   :  { %s1871_s21 = smov 0   ;;  %s1873_s22 = smov 0  }
  0x10   :  { %s1875_s23 = smov 0   ;;  %s1877_s24 = smov 0  }
  0x11 LB: > { %2226 = sst [smem:[#allocation11_spill]] %s1763_s17  ;;  %s1382_s25 = sadd.s32 4294967295, %s1791_s24   ;;  %s1791_s24 = sphi %s1877_s24, %s28_s24   ;;  %s1787_s23 = sphi %s1875_s23, %s2266_s23   ;;  %s1783_s22 = sphi %s1873_s22, %s2265_s22   ;;  %s1779_s21 = sphi %s1871_s21, %s2264_s21   ;;  %s1775_s20 = sphi %s1869_s20, %s2263_s20   ;;  %s1771_s19 = sphi %s1867_s19, %s2262_s19   ;;  %s1767_s18 = sphi %s1865_s18, %s2261_s18   ;;  %s1763_s17 = sphi %s1863_s17, %s2260_s17  }
  0x12   : > { %2227 = sst [smem:[#allocation12_spill]] %s1767_s18  ;;  %s1383_s26 = sadd.s32 4294967294, %s1791_s24  }
  0x13   : > { %2228 = sst [smem:[#allocation13_spill]] %s1771_s19  ;;  %p86_p0 = scmp.ne.s32.totalorder %s1767_s18, %s1763_s17 }
  0x14   : > { %2229 = sst [smem:[#allocation14_spill]] %s1783_s22  ;;  %p1907_p1 = scmp.eq.s32.totalorder %s1382_s25, 0 }
  0x15   : > { %2230 = sst [smem:[#allocation15_spill]] %s1787_s23  ;;  %p1911_p2 = scmp.eq.s32.totalorder %s1382_s25, 3 }
  0x16   : > { %2231 = sst [smem:[#allocation16_spill]] %s1791_s24  ;;  %p345_p3 = scmp.eq.s32.totalorder %s1383_s26, 3 }
  0x17   : > { %p1917_p4 = por %p1907_p1, %p86_p0  ;;  %p1384_p5 = scmp.ge.s32.totalorder %s1791_s24, 1 }
  0x18   : > { %p1922_p6 = por %p345_p3, %p86_p0  ;;  %p352_p7 = scmp.lt.s32.totalorder %s1791_s24, 5 }
  0x19   : > { %s1793_s13 = smov [#allocation5]   ;;  %s37_s15 = sadd.s32 1, %s1783_s22 }
  0x1a   : > { %s2235_s30 = scalar_select %p1922_p6, 1, 0 }
  0x1b   : > { %p1927_p8 = pnand %p1384_p5, %p352_p7  ;;  %s365_s14 = sshll.u32 %s1793_s13, 4  ;;  %s366_s14 = int_to_ptr.vmem [resolvable:$true] %s365_s14 }
  0x1c   : > { %2236 = sst [smem:[#allocation17_spill]] %s2235_s30  ;;  %s1648_s16 = scalar_lea.vmem %s366_s14, 128 }
  0x1d   : > { %p1523_p9 = pneg %p1927_p8  ;;  %p1649_p12 = scmp.ne.s32.totalorder %s366_s14, %s1648_s16 }
  0x1e   : > { %p1656_p3 = scmp.lt.s32.totalorder %s366_s14, %s366_s14  ;;  %p1657_p6 = scmp.lt.s32.totalorder %s1648_s16, %s1648_s16 }
  0x1f   : > { %p1524_p10 = pnand %p1523_p9, %p1907_p1 }
  0x20   : > { %p1658_p5 = por %p1657_p6, %p1656_p3 }
  0x21   : > { %p1639_p11 = pneg %p1524_p10 }
  0x23   : > { %p1651_p13 = pnand %p1649_p12, %p1639_p11 }
  0x25   : > { %p1652_p0 = pneg %p1651_p13 }
  0x27   : > { %p1659_p7 = pnand %p1658_p5, %p1652_p0 }
  0x29   : > { %1662 = shalt.err (!%p1659_p7)
}
  0x2a   : > { %s2238_s4 = sld [smem:[#allocation25_spill]]  ;;  %p38_p9 = scmp.ge.s32.totalorder %s37_s15, 2 }
  0x2b   : > { %s40_s13 = sadd.s32 1, %s1787_s23  ;;  %s73_s16 = sadd.s32 1, %s1771_s19 }
  0x2c   : > { %p80_p6 = scmp.ne.s32.totalorder %s1771_s19, %s1767_s18  ;;  %s2268_s15 = smov (%p38_p9, %s37_s15), 0 }
  0x2d   : > { %2239 = sst [smem:[#allocation18_spill]] %s2268_s15  ;;  %s2270_s13 = smov (!%p38_p9, %s40_s13), %s1787_s23 }
  0x2e   : > { %p81_p11 = scmp.eq.s32.totalorder %s1791_s24, 0  ;;  %p1949_p12 = por %p1911_p2, %p80_p6 }
  0x2f   : > { %p42_p13 = scmp.ge.s32.totalorder %s2270_s13, 2  ;;  %p1536_p0 = scmp.lt.s32.totalorder %s1791_s24, 4 }
  0x30   : > { %1526 = dma.hbm_to_vmem [thread:$0]  (!%p1524_p10), %s2238_s4, 128, %s366_s14, [#allocation6]  }
  0x31   : > { %s2240_s25 = scalar_select %p1949_p12, 1, 0 }
  0x32   : > { %p82_p3 = por %p81_p11, %p80_p6  ;;  %s383_s14 = sand.u32 1, %s1771_s19  }
  0x33   : > { %2241 = sst [smem:[#allocation19_spill]] %s2240_s25  ;;  %s2272_s13 = smov (%p42_p13, %s2270_s13), 0 }
  0x34   : > { %2242 = sst [smem:[#allocation20_spill]] %s2272_s13  ;;  %s1387_s26 = sshll.u32 %s383_s14, 3 }
  0x35   : > { %s70_s4 = ssub.s32 %s1787_s23, %s2272_s13  ;;  %s1388_s15 = sshll.u32 %s1787_s23, 7 }
  0x36   : > { %p71_p10 = scmp.eq.s32.totalorder %s70_s4, 0  ;;  %s2243_s1 = sld [smem:[#allocation23_spill]] }
  0x37   : > { %s387_s17 = scalar_lea.vmem [#allocation2], %s1387_s26  ;;  %p1968_p2 = pnand %p1536_p0, %p82_p3 }
  0x38   : > { %s394_s11 = sshll.u32 %s387_s17, 4  ;;  %s384_s9 = scalar_lea.sflag [#allocation3], %s383_s14  ;;  %s395_s11 = int_to_ptr.vmem [resolvable:$true] %s394_s11 }
  0x39   : > { %s1964_s10 = scalar_select %p71_p10, %s1771_s19, %s73_s16  }
  0x3a   : > { %p1665_p5 = pneg %p1968_p2  ;;  %s1676_s4 = scalar_lea.vmem %s395_s11, 128 }
  0x3b   : > { %2244 = sst [smem:[#allocation21_spill]] %s1964_s10  ;;  %p1677_p7 = scmp.ne.s32.totalorder %s395_s11, %s1676_s4 }
  0x3c   : > { %s392_s28 = scalar_lea.hbm %s2243_s1, %s1388_s15  ;;  %s1794_s22 = smov [#allocation2]  }
  0x3d   : > { %p1679_p9 = pnand %p1677_p7, %p1665_p5  ;;  %s1681_s30 = sshll.u32 %s1794_s22, 4  ;;  %s1682_s30 = int_to_ptr.vmem [resolvable:$false] %s1681_s30 }
  0x3e   : > { %s1683_s17 = scalar_lea.vmem %s1682_s30, 256  ;;  %p1684_p11 = scmp.lt.s32.totalorder %s395_s11, %s1682_s30 }
  0x3f   : > { %p1680_p6 = pneg %p1679_p9  ;;  %p1685_p13 = scmp.lt.s32.totalorder %s1683_s17, %s1676_s4 }
  0x41   : > { %p1686_p10 = por %p1685_p13, %p1684_p11 }
  0x43   : > { %p1687_p12 = pnand %p1686_p10, %p1680_p6 }
  0x45   : > { %1690 = shalt.err (!%p1687_p12)
}
  0x46   : > { %1530 = dma.hbm_to_vmem [thread:$0]  (!%p1968_p2), %s392_s28, 128, %s395_s11, %s384_s9  }
  0x47   : > { %461 = sbr.rel (%p1927_p8) target bundleno = 2617 (0xa39), region = 64  ;;  %s1979_s15 = sand.u32 (!%p1927_p8), 1, %s1767_s18  }
  0x48   : > { %s1390_s16 = sshll.u32 (!%p1927_p8), %s1979_s15, 3  ;;  %s464_s14 = scalar_lea.sflag (!%p1927_p8), [#allocation3], %s1979_s15 }
  0x49   : > { %s1983_s26 = scalar_lea.vmem (!%p1927_p8), [#allocation2], %s1390_s16 }
  0x4c   : > { %1750 = dma.done.wait (%p1917_p4), %s464_s14, 128  }
  0x4d   : > { %1752 = vsyncadd (%p1917_p4), %s464_s14, 4294967168 }
  0x4e   : > { %1754 = dma.done.wait (%p1907_p1), [#allocation6], 128  }
  0x4f   : > { %1756 = vsyncadd (%p1907_p1), [#allocation6], 4294967168  ;;  %p548_p8 = scmp.lt.s32.totalorder %s1779_s21, 1  ;;  %p559_p12 = scmp.lt.s32.totalorder %s1775_s20, 1 }
  0x50   : > { %s2246_s0 = sld [smem:[#allocation22_spill]]  ;;  %s2044_s12 = scalar_lea.vmem [#allocation7], %s1390_s16 }
  0x51   : > { %s1996_s9 = scalar_select %p548_p8, %s1779_s21, 1 }
  0x52   : > { %s1999_s11 = scalar_select %p559_p12, %s1775_s20, 1 }
  0x53   : > { %s1393_s29 = sshll.u32 %s1996_s9, 3  ;;  %s2247_s2 = sld [smem:[#allocation24_spill]] }
  0x54   : > { %s1429_s1 = sshll.u32 %s1999_s11, 4  ;;  %s2248_s5 = sld [smem:[#allocation26_spill]] }
  0x55   : > { %s2025_s25 = scalar_lea.vmem %s2199_s6, %s1429_s1  ;;  %s2030_s30 = scalar_lea.vmem %s2200_s7, %s1429_s1 }
  0x56   : > { %s551_s22 = scalar_lea.vmem %s2246_s0, %s1393_s29  ;;  %s1403_s13 = sshll.u32 %s1999_s11, 3 }
  0x57   : > { %s2250_s19 = sld [smem:[#allocation28_spill]]  ;;  %p1404_p1 = scmp.ne.s32.totalorder %s1775_s20, 0 }
  0x59   : > { %s2012_s14 = scalar_lea.vmem %s2247_s2, %s1393_s29  ;;  %s1432_s29 = sshll.u32 %s1999_s11, 5 }
  0x5a   : > { %s563_s24 = scalar_lea.vmem %s2248_s5, %s1429_s1  ;;  %s2249_s2 = sld [smem:[#allocation27_spill]] }
  0x5c   : > { %590 = sbr.rel (%p1404_p1) target bundleno = 99 (0x63), region = 76 }
  0x5d   : > { %s2042_s5 = scalar_lea.vmem %s2250_s19, %s1403_s13 }
  0x60   : > { %s2036_s23 = scalar_lea.vmem %s2249_s2, %s1432_s29 }
  0x61   : > { %v591_v0 = vld [vmem:[%s551_s22] sm:$0xff]  ;;  %vm592_vm0 = vcmask 261120  }
  0x62   : > { %593 = vst.msk [vmem:[%s2044_s12] sm:$0xff] %vm592_vm0, %v591_v0 }
  0x63 PF: > { %v1613_v1 = vld [vmem:[%s563_s24 + $0x8] sm:$0xff]   ;;  %v1795_v2 = vmov 0.0   ;;  %v1614_v3 = vld [vmem:[%s563_s24] sm:$0xff]   ;;  %vm1796_vm1 = vmmov 0   ;;  %vm624_vm2 = vcmask 261120   ;;  %s1797_s0 = smov 96   ;;  %s2251_s20 = scalar_lea.vmem %s2196_s3, %s1996_s9 }
  0x64   : > { %1455 = vmatprep.subr.bf16.mxu0 %v1795_v2  ;;  %1463 = vmatprep.subr.bf16.mxu1 %v1795_v2  ;;  %v595_v5 = vld [vmem:[%s1983_s26] sm:$0xff]  ;;  %s1798_s1 = smov 112   ;;  %vm674_vm3 = vcmask 130048   ;;  %v599_v19 = vld [vmem:[#allocation5] sm:$0xff]  ;;  %vm769_vm4 = vcmask 64512   ;;  %s1799_s24 = smov 64  }
  0x65   : > { %1456 = vmatpush3.bf16.msra.mxu0 %v1613_v1  ;;  %1459 = vmatprep.mubr.msk.bf16.mxu0 %vm1796_vm1, %v1795_v2  ;;  %v1405_v18 = vld [vmem:[%s2251_s20] ss:$0 sm:$0xff]  ;;  %vm799_vm5 = vcmask 1043456   ;;  %v1615_v55 = vld [vmem:[%s2025_s25 + $0x8] sm:$0xff]   ;;  %s1800_s16 = smov 16   ;;  %s2252_s9 = scalar_lea.vmem %s2201_s8, %s1999_s11  ;;  %vm1105_vm6 = vcmask 523264  }
  0x66   : > { %1457 = vmatprep.subr.bf16.mxu0 %v1795_v2  ;;  %1465 = vmatprep.mubr.msk.bf16.mxu1 %vm1796_vm1, %v1795_v2  ;;  %v606_v20 = vadd.f32 %v1405_v18, %v599_v19  ;;  %v1616_v56 = vld [vmem:[%s2025_s25] sm:$0xff]   ;;  %v1801_v19 = vmov 0   ;;  %s2253_s11 = sld [smem:[#allocation19_spill]]  ;;  %s1426_s25 = sshll.u32 %s1779_s21, 7 }
  0x67   : > { %v597_v18 = vld [vmem:[%s2012_s14] sm:$0xff]  ;;  %1611 = vset.pattern.permute.xlu1 %v1801_v19  ;;  %1612 = vset.pattern.permute.xlu0 %v1801_v19  ;;  %s1189_s22 = sshll.u32 %s2044_s12, 4  ;;  %s2254_s28 = sld [smem:[#allocation29_spill]]  ;;  %s1190_s22 = int_to_ptr.vmem [resolvable:$true] %s1189_s22 }
  0x68   : > { %s1691_s29 = scalar_lea.vmem %s1190_s22, 128  ;;  %s1802_s17 = smov [#allocation7]  }
  0x69   : > { %v594_v4 = vld [vmem:[%s2044_s12] sm:$0xff]  ;;  %1458 = vmatpush3.bf16.msra.mxu0 %v1614_v3  ;;  %p1692_p4 = scmp.ne.s32.totalorder %s1190_s22, %s1691_s29 }
  0x6a   : > { %v2055_v6 = vadd.f32 %v595_v5, %v594_v4  ;;  %1469 = vmatprep.subr.bf16.mxu0 %v1795_v2  ;;  %v902_v5 = vlaneseq }
  0x6c   : > { %v607_v7 = vpack.c.bf16 %v2055_v6, %v2055_v6  ;;  %p2255_p0 = scmp.ne.s32.totalorder %s2253_s11, 0 }
  0x6d   : > { %s1187_s4 = scalar_lea.hbm %s2254_s28, %s1426_s25 }
  0x6e   : > { %1460 = vmatmul.mubr.msk.bf16.vlgmr.msra.gmra.mxu0 %vm624_vm2, %v607_v7  ;;  %v2102_v7 = vshrl.u32 %v902_v5, 7  ;;  %p1693_p3 = pnand %p1692_p4, %p2255_p0 }
  0x6f   : > { %1471 = vmatprep.mubr.msk.bf16.mxu0 %vm1796_vm1, %v1795_v2 }
  0x70   : > { %p1694_p2 = pneg %p1693_p3 }
 0x12e   : > { %v662_v8 = vpop.f32.mrf.mxu0 }
 0x12f   : > { %v668_v9 = vpack.c.bf16 %v662_v8, %v662_v8  ;;  %v904_v8 = vsub.s32 0, %v2102_v7 }
 0x130   : > { %v1461_v10 = vpop.f32.mrf.mxu0 }
 0x131   : > { %672 = vrot.lane.b32.xlu1 %v668_v9, %s1797_s0  ;;  %670 = vrot.lane.b32.xlu0 %v668_v9, %s1798_s1 }
 0x132   : > { %v665_v11 = vpop.f32.mrf.mxu0 }
 0x134   : > { %v1462_v12 = vpop.f32.mrf.mxu0 }
 0x1a3   : > { %v673_v13 = vpop.permute.xlu1 %672  ;;  %v671_v14 = vpop.permute.xlu0 %670 }
 0x1a4   : > { %721 = vrot.lane.b32.xlu0 %v671_v14, %s1797_s0  ;;  %v679_v15 = vsel %vm674_vm3, %v673_v13, 0 }
 0x1a5   : > { %1464 = vmatpush3.bf16.xpose.msra.mxu1 %v679_v15 }
 0x1a6   : > { %1475 = vmatprep.subr.bf16.mxu1 %v1795_v2 }
 0x1ac   : > { %1466 = vmatmul.mubr.msk.bf16.vlgmr.msra.gmra.mxu1 %vm674_vm3, %v668_v9 }
 0x1ad   : > { %1477 = vmatprep.mubr.msk.bf16.mxu1 %vm1796_vm1, %v1795_v2 }
 0x216   : > { %v722_v16 = vpop.permute.xlu0 %721 }
 0x217   : > { %v727_v17 = vsel %vm674_vm3, %v722_v16, 0 }
 0x218   : > { %1470 = vmatpush3.bf16.xpose.msra.mxu0 %v727_v17 }
 0x219   : > { %1481 = vmatprep.subr.bf16.mxu0 %v1795_v2 }
 0x21f   : > { %1472 = vmatmul.mubr.msk.bf16.vlgmr.msra.gmra.mxu0 %vm674_vm3, %v671_v14 }
 0x220   : > { %1483 = vmatprep.mubr.msk.bf16.mxu0 %vm1796_vm1, %v1795_v2 }
 0x26c   : > { %v715_v21 = vpop.f32.mrf.mxu1 }
 0x26d   : > { %v716_v22 = vadd.f32 %v715_v21, %v606_v20 }
 0x26e   : > { %v1467_v23 = vpop.f32.mrf.mxu1 }
 0x26f   : > { %v770_v24 = vsel %vm769_vm4, %v716_v22, -inf }
 0x270   : > { %v718_v25 = vpop.f32.mrf.mxu1  ;;  %771 = vmax.xlane.f32.xlu0 %v770_v24 }
 0x271   : > { %v1618_v25 = vld [vmem:[%s2030_s30] sm:$0xff]  }
 0x272   : > { %v1468_v26 = vpop.f32.mrf.mxu1 }
 0x2df   : > { %v763_v27 = vpop.f32.mrf.mxu0 }
 0x2e0   : > { %v764_v28 = vadd.f32 %v763_v27, %v606_v20 }
 0x2e1   : > { %v1473_v29 = vpop.f32.mrf.mxu0 }
 0x2e2   : > { %v773_v30 = vsel %vm769_vm4, %v764_v28, -inf  ;;  %v978_v29 = vsub.s32 1, %v2102_v7 }
 0x2e3   : > { %774 = vmax.xlane.f32.xlu1 %v773_v30  ;;  %v766_v31 = vpop.f32.mrf.mxu0  ;;  %v983_v30 = vsub.s32 2, %v2102_v7 }
 0x2e5   : > { %v1474_v32 = vpop.f32.mrf.mxu0 }
 0x2f4   : > { %843 = vrot.lane.b32.xlu1 %v671_v14, %s1799_s24 }
 0x2f9   : > { %v772_v33 = vpop.xlane.xlu0 %771 }
 0x2fa   : > { %v776_v34 = vsub.f32 %v716_v22, %v772_v33 }
 0x2fc   : > { %v778_v37 = vmul.f32 1.442695, %v776_v34 }
 0x36c   : > { %v775_v35 = vpop.xlane.xlu1 %774 }
 0x36d   : > { %v777_v36 = vsub.f32 %v764_v28, %v775_v35 }
 0x36f   : > { %v780_v38 = vmul.f32 1.442695, %v777_v36 }
 0x370   : > { %v844_v39 = vpop.permute.xlu1 %843 }
 0x371   : > { %1623 = vpow2.f32 %v780_v38  ;;  %v849_v40 = vsel %vm799_vm5, %v844_v39, 0 }
 0x372   : > { %1482 = vmatpush3.bf16.msra.mxu0 %v849_v40  ;;  %1625 = vpow2.f32 %v778_v37  ;;  %v1619_v40 = vld [vmem:[%s2036_s23 + $0x18] sm:$0xff]  }
 0x373   : > { %1495 = vmatprep.subr.bf16.mxu0 %v1795_v2 }
 0x37e   : > { %v1624_v41 = vpop.eup %1623 }
 0x37f   : > { %v785_v42 = vsel %vm769_vm4, %v1624_v41, 0.0  ;;  %v1626_v43 = vpop.eup %1625 }
 0x380   : > { %786 = vadd.xlane.f32.xlu0 %v785_v42  ;;  %v782_v44 = vsel %vm769_vm4, %v1626_v43, 0.0  ;;  %v1621_v42 = vld [vmem:[%s2036_s23 + $0x8] sm:$0xff]  }
 0x384   : > { %783 = vadd.xlane.f32.xlu0 %v782_v44  ;;  %v1416_v44 = vld [vmem:[%s2252_s9] ss:$0 sm:$0xff] }
 0x39a   : > { %794 = vrot.lane.b32.xlu0 %v668_v9, %s1799_s24  ;;  %v2106_v9 = vld [vmem:[%s2042_s5] sm:$0x3f] }
 0x39b   : > { %v905_v10 = vrot.slane %v2106_v9, %v904_v8  ;;  %v979_v31 = vrot.slane %v2106_v9, %v978_v29  ;;  %v984_v34 = vrot.slane %v2106_v9, %v983_v30 }
 0x409   : > { %v787_v45 = vpop.xlane.xlu0 %786 }
 0x40a   : > { %1627 = vrcp.f32 %v787_v45 }
 0x40d   : > { %v784_v46 = vpop.xlane.xlu0 %783 }
 0x40e   : > { %1629 = vrcp.f32 %v784_v46 }
 0x411   : > { %v795_v47 = vpop.permute.xlu0 %794 }
 0x412   : > { %v801_v48 = vsel %vm799_vm5, %v795_v47, 0 }
 0x413   : > { %1476 = vmatpush3.bf16.msra.mxu1 %v801_v48 }
 0x414   : > { %1487 = vmatprep.subr.bf16.mxu1 %v1795_v2 }
 0x417   : > { %v1628_v49 = vpop.eup %1627 }
 0x418   : > { %v791_v50 = vmul.f32 %v1628_v49, %v1624_v41  ;;  %v1620_v41 = vld [vmem:[%s2036_s23 + $0x10] sm:$0xff]  }
 0x41a   : > { %v793_v51 = vpack.c.bf16 %v791_v50, %v791_v50 }
 0x41b   : > { %v1630_v52 = vpop.eup %1629 }
 0x41c   : > { %1484 = vmatmul.mubr.msk.bf16.vlgmr.msra.gmra.mxu0 %vm769_vm4, %v793_v51  ;;  %v790_v53 = vmul.f32 %v1630_v52, %v1626_v43  ;;  %v1622_v43 = vld [vmem:[%s2036_s23] sm:$0xff]   ;;  %s1695_s23 = sshll.u32 %s1802_s17, 4  ;;  %s1696_s23 = int_to_ptr.vmem [resolvable:$false] %s1695_s23 }
 0x41d   : > { %1499 = vmatprep.mubr.msk.bf16.mxu0 %vm1796_vm1, %v1795_v2  ;;  %s1697_s21 = scalar_lea.vmem %s1696_s23, 256  ;;  %p1698_p5 = scmp.lt.s32.totalorder %s1190_s22, %s1696_s23 }
 0x41e   : > { %v792_v54 = vpack.c.bf16 %v790_v53, %v790_v53  ;;  %p1699_p7 = scmp.lt.s32.totalorder %s1697_s21, %s1691_s29 }
 0x420   : > { %1478 = vmatmul.mubr.msk.bf16.vlgmr.msra.gmra.mxu1 %vm769_vm4, %v792_v54  ;;  %p1700_p9 = por %p1699_p7, %p1698_p5 }
 0x421   : > { %1491 = vmatprep.mubr.msk.bf16.mxu1 %vm1796_vm1, %v1795_v2  ;;  %1488 = vmatpush3.bf16.msra.mxu1 %v1615_v55 }
 0x422   : > { %1489 = vmatprep.subr.bf16.mxu1 %v1795_v2  ;;  %p1701_p6 = pnand %p1700_p9, %p1694_p2 }
 0x425   : > { %1490 = vmatpush3.bf16.msra.mxu1 %v1616_v56 }
 0x426   : > { %1503 = vmatprep.subr.bf16.mxu1 %v1795_v2 }
 0x4dc   : > { %v885_v57 = vpop.f32.mrf.mxu0 }
 0x4dd   : > { %892 = vrot.lane.b32.xlu1 %v885_v57, %s1800_s16 }
 0x4de   : > { %v1485_v58 = vpop.f32.mrf.mxu0 }
 0x4e0   : > { %v837_v59 = vpop.f32.mrf.mxu1  ;;  %v888_v60 = vpop.f32.mrf.mxu0 }
 0x4e2   : > { %v1479_v61 = vpop.f32.mrf.mxu1  ;;  %v1486_v62 = vpop.f32.mrf.mxu0 }
 0x4e4   : > { %v840_v63 = vpop.f32.mrf.mxu1 }
 0x4e6   : > { %v1480_v0 = vpop.f32.mrf.mxu1 }
 0x54f   : > { %v893_v1 = vpop.permute.xlu1 %892 }
 0x550   : > { %v895_v3 = vsel %vm674_vm3, %v837_v59, %v893_v1  ;;  %v1079_v59 = vsub.s32 3, %v2102_v7 }
 0x551   : > { %v897_v4 = vpack.c.bf16 %v895_v3, %v895_v3 }
 0x552   : > { %v1080_v60 = vrot.slane %v2106_v9, %v1079_v59 }
 0x553   : > { %1492 = vmatmul.mubr.msk.bf16.vlgmr.msra.gmra.mxu1 %vm624_vm2, %v897_v4 }
 0x554   : > { %1511 = vmatprep.mubr.msk.bf16.mxu1 %vm1796_vm1, %v1795_v2  ;;  %1504 = vmatpush3.bf16.msra.mxu1 %v1619_v40 }
 0x555   : > { %1505 = vmatprep.subr.bf16.mxu1 %v1795_v2 }
 0x558   : > { %1506 = vmatpush3.bf16.msra.mxu1 %v1620_v41 }
 0x559   : > { %1507 = vmatprep.subr.bf16.mxu1 %v1795_v2 }
 0x55c   : > { %1508 = vmatpush3.bf16.msra.mxu1 %v1621_v42 }
 0x55d   : > { %1509 = vmatprep.subr.bf16.mxu1 %v1795_v2 }
 0x560   : > { %1510 = vmatpush3.bf16.msra.mxu1 %v1622_v43 }
 0x613   : > { %v955_v11 = vpop.f32.mrf.mxu1 }
 0x614   : > { %v956_v12 = vadd.f32 %v955_v11, %v905_v10 }
 0x615   : > { %v1493_v13 = vpop.f32.mrf.mxu1 }
 0x616   : > { %v961_v14 = vadd.f32 %v956_v12, %v2055_v6  ;;  %v1617_v6 = vld [vmem:[%s2030_s30 + $0x8] sm:$0xff]   ;;  %s1176_s30 = scalar_lea.sflag [#allocation4], %s1979_s15 }
 0x617   : > { %v958_v15 = vpop.f32.mrf.mxu1  ;;  %1496 = vmatpush3.bf16.msra.mxu0 %v1617_v6 }
 0x618   : > { %v962_v16 = vsel %vm624_vm2, %v961_v14, 0.0  ;;  %1497 = vmatprep.subr.bf16.mxu0 %v1795_v2 }
 0x619   : > { %963 = vadd.xlane.f32.xlu1 %v962_v16  ;;  %v1494_v17 = vpop.f32.mrf.mxu1  ;;  %v1165_v16 = vsub.s32 4, %v2102_v7 }
 0x61a   : > { %v1170_v17 = vsub.s32 5, %v2102_v7 }
 0x61b   : > { %1498 = vmatpush3.bf16.msra.mxu0 %v1618_v25 }
 0x62a   : > { %988 = vperm.xlu1 %1611, %v597_v18   ;;  %v1166_v18 = vrot.slane %v2106_v9, %v1165_v16 }
 0x6a2   : > { %v964_v20 = vpop.xlane.xlu1 %963 }
 0x6a3   : > { %v966_v21 = vmul.f32 0.03125, %v964_v20 }
 0x6a5   : > { %v967_v22 = vsub.f32 %v961_v14, %v966_v21  ;;  %v1171_v21 = vrot.slane %v2106_v9, %v1170_v17 }
 0x6a6   : > { %v2120_v36 = vpop.permute.xlu1 %988 }
 0x6a7   : > { %v968_v23 = vmul.f32 %v967_v22, %v967_v22 }
 0x6a9   : > { %v969_v24 = vsel %vm624_vm2, %v968_v23, 0.0 }
 0x6aa   : > { %970 = vadd.xlane.f32.xlu0 %v969_v24 }
 0x733   : > { %v971_v26 = vpop.xlane.xlu0 %970 }
 0x734   : > { %v972_v27 = vmul.f32 0.03125, %v971_v26 }
 0x736   : > { %v973_v28 = vadd.f32 1e-06, %v972_v27 }
 0x738   : > { %1631 = vrsqrt.f32 %v973_v28 }
 0x745   : > { %v1632_v32 = vpop.eup %1631 }
 0x746   : > { %v975_v33 = vmul.f32 %v1632_v32, %v967_v22 }
 0x748   : > { %v980_v35 = vmul.f32 %v979_v31, %v975_v33 }
 0x74a   : > { %v985_v37 = vadd.f32 %v984_v34, %v980_v35 }
 0x74c   : > { %v991_v38 = vmul.f32 %v2120_v36, %v985_v37 }
 0x74e   : > { %v992_v39 = vpack.c.bf16 %v991_v38, %v991_v38 }
 0x750   : > { %1500 = vmatmul.mubr.msk.bf16.vlgmr.msra.gmra.mxu0 %vm624_vm2, %v992_v39 }
 0x810   : > { %v1053_v45 = vpop.f32.mrf.mxu0 }
 0x811   : > { %v1054_v46 = vadd.f32 %v1416_v44, %v1053_v45 }
 0x812   : > { %v1501_v47 = vpop.f32.mrf.mxu0 }
 0x813   : > { %v1060_v48 = vmul.f32 0.044715, %v1054_v46  ;;  %v1059_v56 = vmul.f32 0.5, %v1054_v46 }
 0x814   : > { %v1056_v49 = vpop.f32.mrf.mxu0 }
 0x815   : > { %v1061_v50 = vmul.f32 %v1060_v48, %v1054_v46 }
 0x816   : > { %v1502_v51 = vpop.f32.mrf.mxu0 }
 0x817   : > { %v1062_v52 = vmul.f32 %v1061_v50, %v1054_v46 }
 0x819   : > { %v1063_v53 = vadd.f32 %v1062_v52, %v1054_v46 }
 0x81b   : > { %v1064_v54 = vmul.f32 0.7978846, %v1063_v53 }
 0x81d   : > { %1633 = vtanh.f32 %v1064_v54 }
 0x82a   : > { %v1634_v55 = vpop.eup %1633 }
 0x82b   : > { %v1066_v2 = vadd.f32 1.0, %v1634_v55 }
 0x82d   : > { %v1067_v57 = vmul.f32 %v1066_v2, %v1059_v56 }
 0x82f   : > { %v1068_v58 = vpack.c.bf16 %v1067_v57, %v1067_v57 }
 0x831   : > { %1512 = vmatmul.mubr.msk.bf16.vlgmr.msra.gmra.mxu1 %vm1105_vm6, %v1068_v58 }
 0x8f1   : > { %v1143_v61 = vpop.f32.mrf.mxu1 }
 0x8f2   : > { %v1144_v62 = vadd.f32 %v1143_v61, %v1080_v60 }
 0x8f3   : > { %v1513_v63 = vpop.f32.mrf.mxu1 }
 0x8f4   : > { %v1149_v0 = vadd.f32 %v1144_v62, %v991_v38 }
 0x8f5   : > { %v1146_v1 = vpop.f32.mrf.mxu1 }
 0x8f6   : > { %v1150_v3 = vsel %vm624_vm2, %v1149_v0, 0.0 }
 0x8f7   : > { %1151 = vadd.xlane.f32.xlu0 %v1150_v3  ;;  %v1514_v4 = vpop.f32.mrf.mxu1 }
 0x980   : > { %v1152_v5 = vpop.xlane.xlu0 %1151 }
 0x981   : > { %v1153_v8 = vmul.f32 0.03125, %v1152_v5 }
 0x983   : > { %v1154_v10 = vsub.f32 %v1149_v0, %v1153_v8 }
 0x985   : > { %v1155_v11 = vmul.f32 %v1154_v10, %v1154_v10 }
 0x987   : > { %v1156_v12 = vsel %vm624_vm2, %v1155_v11, 0.0 }
 0x988   : > { %1157 = vadd.xlane.f32.xlu0 %v1156_v12 }
 0xa11   : > { %v1158_v13 = vpop.xlane.xlu0 %1157 }
 0xa12   : > { %v1159_v14 = vmul.f32 0.03125, %v1158_v13 }
 0xa14   : > { %v1160_v15 = vadd.f32 1e-06, %v1159_v14 }
 0xa16   : > { %1635 = vrsqrt.f32 %v1160_v15 }
 0xa23   : > { %v1636_v19 = vpop.eup %1635 }
 0xa24   : > { %v1162_v20 = vmul.f32 %v1636_v19, %v1154_v10 }
 0xa26   : > { %v1167_v22 = vmul.f32 %v1166_v18, %v1162_v20 }
 0xa28   : > { %v1172_v23 = vadd.f32 %v1171_v21, %v1167_v22 }
 0xa2a   : > { %v1173_v24 = vmul.f32 %v1172_v23, %v2120_v36 }
 0xa2c   : > { %1174 = vst.msk [vmem:[%s2044_s12] sm:$0xff] %vm624_vm2, %v1173_v24 }
 0xa2d   : > { %1704 = shalt.err (!%p1701_p6)
}
 0xa2e   : > { %s1705_s13 = scalar_lea.hbm %s1187_s4, 128  ;;  %s1709_s19 = scalar_lea.hbm %s2254_s28, 256 }
 0xa2f   : > { %p1706_p11 = scmp.ne.s32.totalorder %s1187_s4, %s1705_s13  ;;  %p1710_p8 = scmp.lt.s32.totalorder %s1187_s4, %s2254_s28 }
 0xa30   : > { %p1711_p12 = scmp.lt.s32.totalorder %s1709_s19, %s1705_s13 }
 0xa31   : > { %p1707_p13 = pnand %p1706_p11, %p2255_p0 }
 0xa32   : > { %p1712_p1 = por %p1711_p12, %p1710_p8 }
 0xa33   : > { %p1708_p10 = pneg %p1707_p13 }
 0xa35   : > { %p1713_p4 = pnand %p1712_p1, %p1708_p10 }
 0xa37   : > { %1716 = shalt.err (!%p1713_p4)
}
 0xa38   : > { %1521 = dma.vmem_to_hbm [thread:$0]  (%p2255_p0), %s1190_s22, 128, %s1187_s4, %s1176_s30  }
 0xa39 PF: > { %s2256_s1 = sld [smem:[#allocation16_spill]] }
 0xa3a   : > { %s2257_s2 = sld [smem:[#allocation11_spill]] }
 0xa3b   : > { %s2258_s10 = sld [smem:[#allocation17_spill]] }
 0xa3f   : > { %p1538_p3 = scmp.ge.s32.totalorder %s2256_s1, 2 }
 0xa40   : > { %s1201_s20 = sand.u32 1, %s2257_s2  }
 0xa41   : > { %p2259_p2 = scmp.ne.s32.totalorder %s2258_s10, 0  ;;  %s1202_s24 = scalar_lea.sflag [#allocation4], %s1201_s20 }
 0xa43   : > { %p1532_p5 = pnand %p1538_p3, %p2259_p2 }
 0xa45   : > { %p1533_p7 = pneg %p1532_p5 }
 0xa47   : > { %1758 = dma.done.wait (%p1533_p7), %s1202_s24, 128  }
 0xa48   : > { %1760 = vsyncadd (%p1533_p7), %s1202_s24, 4294967168  ;;  %s28_s24 = sadd.s32 1, %s2256_s1   ;;  %s2260_s17 = sld [smem:[#allocation12_spill]] }
 0xa49   : > { %p25_p9 = scmp.ge.s32.totalorder %s28_s24, 6   ;;  %s2261_s18 = sld [smem:[#allocation13_spill]] }
 0xa4a   : > { %s2262_s19 = sld [smem:[#allocation21_spill]] }
 0xa4b   : > { %s2263_s20 = sld [smem:[#allocation14_spill]]  ;;  %27 = sbr.rel (!%p25_p9) target bundleno = 17 (0x11), region = 144 }
 0xa4c   : > { %s2264_s21 = sld [smem:[#allocation15_spill]] }
 0xa4d   : > { %s2265_s22 = sld [smem:[#allocation18_spill]] }
 0xa4e   : > { %s2266_s23 = sld [smem:[#allocation20_spill]] }
 0xa50   :  { %1207 = vsyncpa [#allocation3], 1 }
 0xa51   :  { %1209 = vsyncpa [#allocation3 + $0x1], 1 }
 0xa52   :  { %1210 = vsyncpa [#allocation6], 1 }
 0xa53   :  { %1211 = vsyncpa [#allocation4], 1 }
 0xa54   :  { %1213 = vsyncpa [#allocation4 + $0x1], 1 }

</bundles_post_ra>
